<compile_context>
chip_gen: v6e
topology: v6e:2x2x1
jax: 0.10.0
libtpu: 0.0.40
codegen_flags: <defaults>
</compile_context>

<pallas_src>
import jax
import jax.numpy as jnp
from jax.experimental import pallas as pl
from jax.experimental.pallas import tpu as pltpu

LANES = 128


def sage_agg_kernel(a_ref, hsrc_ref, invdeg_ref, hself_ref, o_ref):
    """One (dst-tile, src-chunk) step of  out = (A @ h_src) * inv_deg + h_self.

    a_ref:      (tm, tk)  adjacency chunk (dst rows x src cols), 0/1 entries,
                stored bf16 (or int8 -> upcast to bf16 right before the MXU).
    hsrc_ref:   (tk, Fp)  bf16 projected source features (fc_neigh already applied).
    invdeg_ref: (tm, 1)   f32 1 / max(in_degree, 1), computed over the FULL row.
    hself_ref:  (tm, Fp)  f32 self branch: fc_self(feat_dst) + bias (lane-padded).
    o_ref:      (tm, Fp)  f32 output block, resident across the src-chunk axis;
                used directly as the accumulator (no extra VMEM scratch).
    """
    k = pl.program_id(1)

    @pl.when(k == 0)
    def _():
        o_ref[...] = jnp.zeros_like(o_ref)

    a = a_ref[...]
    if a.dtype != jnp.bfloat16:
        # int8 storage (exact for 0/1 edges): upcast just before the dot.
        a = a.astype(jnp.bfloat16)
    # Native bf16 x bf16 MXU matmul with f32 accumulation.
    o_ref[...] += jnp.dot(a, hsrc_ref[...], preferred_element_type=jnp.float32)

    @pl.when(k == pl.num_programs(1) - 1)
    def _():
        # fn.mean('m','neigh'): sum * 1/deg (zero in-degree rows stay 0), then + self.
        o_ref[...] = o_ref[...] * invdeg_ref[...] + hself_ref[...]


def _pick_tile(n, target):
    """Largest tile <= min(target, n) that divides n, preferring multiples of 256."""
    t = min(target, n)
    for cand in range(t - (t % 256), 0, -256):
        if n % cand == 0:
            return cand
    while n % t:
        t -= 1
    return t


def sage_conv_mean(feat, adj, w_neigh, w_self, b_self, *, tm=1024, tk=1024,
                   adj_stream_dtype=jnp.bfloat16):
    """SAGEConv 'mean' forward.

    feat: (N, Fin) f32, adj: (N, N) dense adjacency (dst x src, 0/1 entries),
    w_neigh / w_self: torch layout (Fout, Fin), b_self: (Fout,).
    """
    N, Fin = feat.shape
    Fout = w_neigh.shape[0]

    # Tile selection: as large as VMEM allows (per-step overhead amortisation),
    # multiples of 256 when possible (v6e/v7x MXU cadence), clamped/divisor of N.
    # v6e (128 MiB VMEM) can push tm=tk=2048; v7x (64 MiB per TC) cap ~1024-1536.
    # Keep N//tm >= 2 on v7x so the "parallel" dst axis splits across both cores.
    tm = _pick_tile(N, tm)
    tk = _pick_tile(N, tk)
    assert N % tm == 0 and N % tk == 0
    assert (tm == N or tm % 8 == 0) and (tk == N or tk % LANES == 0), \
        "tiles must satisfy the (8,128) layout constraint"

    # Pad the output feature dim to a full 128-lane register (lane-dense vst).
    Fp = ((Fout + LANES - 1) // LANES) * LANES

    wn_t = jnp.zeros((Fin, Fp), jnp.float32).at[:, :Fout].set(jnp.asarray(w_neigh).T)
    ws_t = jnp.zeros((Fin, Fp), jnp.float32).at[:, :Fout].set(jnp.asarray(w_self).T)
    b_p = jnp.zeros((1, Fp), jnp.float32).at[0, :Fout].set(jnp.asarray(b_self))

    # Hoisted projections: computed once in XLA instead of once per grid step.
    # h_src in bf16 -> native MXU operand + half the per-node HBM stream.
    h_src = jnp.dot(feat, wn_t).astype(jnp.bfloat16)        # (N, Fp)  fc_neigh
    h_self = (jnp.dot(feat, ws_t) + b_p).astype(jnp.float32)  # (N, Fp)  fc_self + bias

    # Full-row in-degree (kernel only sees src chunks, so the mean's normaliser must
    # be precomputed over the whole row). Zero in-degree -> 0, matching DGL.
    deg = jnp.sum(adj.astype(jnp.float32), axis=-1, keepdims=True)
    inv_deg = 1.0 / jnp.maximum(deg, 1.0)                    # (N, 1) f32

    # 0/1 adjacency is exact in bf16 (and int8); bf16 halves the dominant HBM
    # stream vs f32, int8 halves it again at the cost of an in-kernel bf16 cast.
    adj_stream = adj.astype(adj_stream_dtype)

    # VMEM budget for the double-buffered working set (used to set the scoped limit;
    # v5e's default is only 16 MiB, v6e/v7x default 32 MiB).
    adj_elt = jnp.dtype(adj_stream_dtype).itemsize
    vmem_est = (2 * tm * tk * adj_elt                      # adjacency double buffer
                + (tm * tk * 2 if adj_elt < 2 else 0)      # in-kernel bf16 upcast temp
                + 2 * tk * Fp * 2                          # h_src (bf16)
                + 2 * tm * Fp * 4                          # h_self (f32)
                + 2 * tm * Fp * 4                          # output (f32, = accumulator)
                + 2 * tm * 4)                              # inv_deg
    vmem_limit = int(min(max(2 * vmem_est, 32 << 20), 64 << 20))

    grid = (N // tm, N // tk)   # dst tiles (parallel) x src chunks (reduction)
    out = pl.pallas_call(
        sage_agg_kernel,
        out_shape=jax.ShapeDtypeStruct((N, Fp), jnp.float32),
        grid_spec=pltpu.PrefetchScalarGridSpec(
            num_scalar_prefetch=0,
            grid=grid,
            in_specs=[
                # adjacency chunk; if profiling shows exposed DMA at large tiles,
                # add pipeline_mode=pl.Buffered(3) here rather than shrinking tiles.
                pl.BlockSpec((tm, tk), lambda i, k: (i, k)),
                pl.BlockSpec((tk, Fp), lambda i, k: (k, 0)),   # projected neighbours
                pl.BlockSpec((tm, 1), lambda i, k: (i, 0)),    # 1 / in-degree
                pl.BlockSpec((tm, Fp), lambda i, k: (i, 0)),   # self branch
            ],
            out_specs=pl.BlockSpec((tm, Fp), lambda i, k: (i, 0)),
        ),
        compiler_params=pltpu.CompilerParams(
            dimension_semantics=("parallel", "arbitrary"),
            vmem_limit_bytes=vmem_limit,
        ),
    )(adj_stream, h_src, inv_deg, h_self)

    return out[:, :Fout].astype(feat.dtype)


def _xavier_uniform(key, shape, gain):
    # torch nn.init.xavier_uniform_ on a (fan_out, fan_in) Linear weight
    fan_out, fan_in = shape
    bound = gain * (6.0 / (fan_in + fan_out)) ** 0.5
    return jax.random.uniform(key, shape, jnp.float32, -bound, bound)


if __name__ == "__main__":
    N, Fin, Fout = 256, 32, 16   # in_feats > out_feats -> lin_before_mp = True
    key = jax.random.PRNGKey(0)
    k_feat, k_adj, k_wn, k_ws, k_b = jax.random.split(key, 5)

    feat = jax.random.normal(k_feat, (N, Fin), jnp.float32)
    # deterministic sparse-ish graph as dense adjacency (dst x src), 0/1 entries
    adj = jax.random.bernoulli(k_adj, 0.1, (N, N)).astype(jnp.float32)

    gain = 2.0 ** 0.5  # calculate_gain('relu')
    w_neigh = _xavier_uniform(k_wn, (Fout, Fin), gain)   # fc_neigh.weight, no bias
    w_self = _xavier_uniform(k_ws, (Fout, Fin), gain)    # fc_self.weight
    bound_b = 1.0 / (Fin ** 0.5)                         # torch Linear default bias init
    b_self = jax.random.uniform(k_b, (Fout,), jnp.float32, -bound_b, bound_b)

    out = sage_conv_mean(feat, adj, w_neigh, w_self, b_self)
    out = jax.block_until_ready(out)

    # reference in plain (full f32) JAX; bf16 h_src in the kernel -> ~1e-3 rel rounding,
    # so the tolerance is loosened accordingly.
    h_src_ref = feat @ w_neigh.T
    deg_ref = adj.sum(-1, keepdims=True)
    h_neigh_ref = (adj @ h_src_ref) / jnp.maximum(deg_ref, 1.0)
    ref = feat @ w_self.T + b_self + h_neigh_ref
    assert out.shape == ref.shape
    assert jnp.allclose(out, ref, atol=2e-2, rtol=2e-2), \
        float(jnp.max(jnp.abs(out - ref)))

    print("KERNEL_OK")
</pallas_src>

<mosaic_0001>
module attributes {stable_mosaic.version = 11 : i64} {
  func.func @sage_agg_kernel(%arg0: i32, %arg1: i32, %arg2: memref<256x256xbf16, #tpu.memory_space<vmem>>, %arg3: memref<256x128xbf16, #tpu.memory_space<vmem>>, %arg4: memref<256x1xf32, #tpu.memory_space<vmem>>, %arg5: memref<256x128xf32, #tpu.memory_space<vmem>>, %arg6: memref<256x128xf32, #tpu.memory_space<vmem>>) attributes {dimension_semantics = [#tpu.dimension_semantics<parallel>, #tpu.dimension_semantics<arbitrary>], iteration_bounds = array<i64: 1, 1>, scalar_prefetch = 0 : i64, scratch_operands = 0 : i64, tpu.core_type = #tpu.core_type<tc>, window_params = [{transform_indices = @transform_0, window_bounds = array<i64: 256, 256>}, {transform_indices = @transform_1, window_bounds = array<i64: 256, 128>}, {transform_indices = @transform_2, window_bounds = array<i64: 256, 1>}, {transform_indices = @transform_3, window_bounds = array<i64: 256, 128>}, {transform_indices = @transform_4, window_bounds = array<i64: 256, 128>}]} {
    %c0_i32 = arith.constant 0 : i32
    %0 = arith.cmpi eq, %arg1, %c0_i32 : i32
    %1 = arith.extui %0 : i1 to i32
    %c0_i32_0 = arith.constant 0 : i32
    %2 = arith.cmpi ne, %1, %c0_i32_0 : i32
    scf.if %2 {
      %cst_10 = arith.constant 0.000000e+00 : f32
      %12 = vector.broadcast %cst_10 : f32 to vector<256x128xf32>
      %c0_11 = arith.constant 0 : index
      %c0_12 = arith.constant 0 : index
      %13 = vector.load %arg6[%c0_11, %c0_12] : memref<256x128xf32, #tpu.memory_space<vmem>>, vector<256x128xf32>
      tpu.vector_store %arg6[%c0_11, %c0_12], %12 {strides = array<i32>} : memref<256x128xf32, #tpu.memory_space<vmem>>, vector<256x128xf32>,
    } else {
    }
    %c0 = arith.constant 0 : index
    %c0_1 = arith.constant 0 : index
    %3 = vector.load %arg2[%c0, %c0_1] : memref<256x256xbf16, #tpu.memory_space<vmem>>, vector<256x256xbf16>
    %c0_2 = arith.constant 0 : index
    %c0_3 = arith.constant 0 : index
    %4 = vector.load %arg6[%c0_2, %c0_3] : memref<256x128xf32, #tpu.memory_space<vmem>>, vector<256x128xf32>
    %c0_4 = arith.constant 0 : index
    %c0_5 = arith.constant 0 : index
    %5 = vector.load %arg3[%c0_4, %c0_5] : memref<256x128xbf16, #tpu.memory_space<vmem>>, vector<256x128xbf16>
    %cst = arith.constant dense<0.000000e+00> : vector<256x128xf32>
    %6 = tpu.matmul %3, %5, %cst {dimension_numbers = #tpu.dot_dimension_numbers<[1], [0], [0], [1], [0, 0, 1, 1], [], []>} : vector<256x256xbf16>, vector<256x128xbf16>, vector<256x128xf32> -> vector<256x128xf32>
    %7 = arith.addf %4, %6 : vector<256x128xf32>
    %c0_6 = arith.constant 0 : index
    %c0_7 = arith.constant 0 : index
    %8 = vector.load %arg6[%c0_6, %c0_7] : memref<256x128xf32, #tpu.memory_space<vmem>>, vector<256x128xf32>
    tpu.vector_store %arg6[%c0_6, %c0_7], %7 {strides = array<i32>} : memref<256x128xf32, #tpu.memory_space<vmem>>, vector<256x128xf32>,
    %c0_i32_8 = arith.constant 0 : i32
    %9 = arith.cmpi eq, %arg1, %c0_i32_8 : i32
    %10 = arith.extui %9 : i1 to i32
    %c0_i32_9 = arith.constant 0 : i32
    %11 = arith.cmpi ne, %10, %c0_i32_9 : i32
    scf.if %11 {
      %c0_10 = arith.constant 0 : index
      %c0_11 = arith.constant 0 : index
      %12 = vector.load %arg6[%c0_10, %c0_11] : memref<256x128xf32, #tpu.memory_space<vmem>>, vector<256x128xf32>
      %c0_12 = arith.constant 0 : index
      %c0_13 = arith.constant 0 : index
      %13 = vector.load %arg4[%c0_12, %c0_13] : memref<256x1xf32, #tpu.memory_space<vmem>>, vector<256x1xf32>
      %14 = vector.broadcast %13 : vector<256x1xf32> to vector<256x128xf32>
      %15 = arith.mulf %12, %14 : vector<256x128xf32>
      %c0_14 = arith.constant 0 : index
      %c0_15 = arith.constant 0 : index
      %16 = vector.load %arg5[%c0_14, %c0_15] : memref<256x128xf32, #tpu.memory_space<vmem>>, vector<256x128xf32>
      %17 = arith.addf %15, %16 : vector<256x128xf32>
      %c0_16 = arith.constant 0 : index
      %c0_17 = arith.constant 0 : index
      %18 = vector.load %arg6[%c0_16, %c0_17] : memref<256x128xf32, #tpu.memory_space<vmem>>, vector<256x128xf32>
      tpu.vector_store %arg6[%c0_16, %c0_17], %17 {strides = array<i32>} : memref<256x128xf32, #tpu.memory_space<vmem>>, vector<256x128xf32>,
    } else {
    }
    return
  }
  func.func @transform_0(%arg0: i32, %arg1: i32) -> (i32, i32) {
    %c0_i32 = arith.constant 0 : i32
    return %arg0, %arg1 : i32, i32
  }
  func.func @transform_1(%arg0: i32, %arg1: i32) -> (i32, i32) {
    %c0_i32 = arith.constant 0 : i32
    %c0_i32_0 = arith.constant 0 : i32
    return %arg1, %c0_i32 : i32, i32
  }
  func.func @transform_2(%arg0: i32, %arg1: i32) -> (i32, i32) {
    %c0_i32 = arith.constant 0 : i32
    %c0_i32_0 = arith.constant 0 : i32
    return %arg0, %c0_i32 : i32, i32
  }
  func.func @transform_3(%arg0: i32, %arg1: i32) -> (i32, i32) {
    %c0_i32 = arith.constant 0 : i32
    %c0_i32_0 = arith.constant 0 : i32
    return %arg0, %c0_i32 : i32, i32
  }
  func.func @transform_4(%arg0: i32, %arg1: i32) -> (i32, i32) {
    %c0_i32 = arith.constant 0 : i32
    %c0_i32_0 = arith.constant 0 : i32
    return %arg0, %c0_i32 : i32, i32
  }
}

</mosaic_0001>

<bundles_post_ra>
// kernel: tpu_custom_call.1
= control target key start
LH: loop header
LB: loop body
LE: loop exit
PB: predicated region body
PF: predicated region fallthrough
CT: control target
= control target key end

     0   :  { %9 = vsyncpa [#allocation3], 0  ;;  %s1629_s0 = inlined_call_operand.vmem [shape: bf16[256,256], index: 0, kind: input, shape index: {}]   ;;  %s1630_s1 = inlined_call_operand.hbm [shape: bf16[256,128], index: 1, kind: input, shape index: {}]   ;;  %s1631_s2 = inlined_call_operand.vmem [shape: f32[256,1], index: 2, kind: input, shape index: {}]   ;;  %s1632_s3 = inlined_call_operand.hbm [shape: f32[256,128], index: 3, kind: input, shape index: {}]   ;;  %s1633_s4 = inlined_call_operand.hbm [shape: f32[256,128], index: 4, kind: output, shape index: {}]  }
   0x1   :  { %10 = vsyncpa [#allocation6], 0 }
   0x2   :  { %11 = vsyncpa [#allocation4], 0  ;;  %s1350_s15 = smov [#allocation2]  }
   0x3   :  { %s19_s16 = sshll.u32 %s1350_s15, 4  ;;  %s20_s16 = int_to_ptr.vmem [resolvable:$true] %s19_s16 }
   0x4   :  { %s1292_s17 = scalar_lea.vmem %s20_s16, 2048  ;;  %p1297_p1 = scmp.lt.s32.totalorder %s20_s16, %s20_s16 }
   0x5   :  { %p1293_p0 = scmp.ne.s32.totalorder %s20_s16, %s1292_s17  ;;  %p1298_p2 = scmp.lt.s32.totalorder %s1292_s17, %s1292_s17 }
   0x7   :  { %p1299_p3 = por %p1298_p2, %p1297_p1 }
   0x9   :  { %p1300_p4 = pnand %p1299_p3, %p1293_p0 }
   0xb   :  { %1303 = shalt.err (!%p1300_p4)
}
   0xc   :  { %s1351_s18 = smov 64   ;;  %s1352_s19 = smov 4  }
   0xd   :  { %25 = dma.hbm_to_vmem [thread:$0]  %s1630_s1, 2048, %s20_s16, [#allocation3], %s1351_s18, %s1351_s18, %s1352_s19  }
   0xe   :  { %s1353_s22 = smov [#allocation5]  }
   0xf   :  { %s33_s23 = sshll.u32 %s1353_s22, 4  ;;  %s34_s23 = int_to_ptr.vmem [resolvable:$true] %s33_s23 }
  0x10   :  { %s1312_s24 = scalar_lea.vmem %s34_s23, 4096  ;;  %p1317_p6 = scmp.lt.s32.totalorder %s34_s23, %s34_s23 }
  0x11   :  { %p1313_p5 = scmp.ne.s32.totalorder %s34_s23, %s1312_s24  ;;  %p1318_p7 = scmp.lt.s32.totalorder %s1312_s24, %s1312_s24 }
  0x13   :  { %p1319_p8 = por %p1318_p7, %p1317_p6 }
  0x15   :  { %p1320_p9 = pnand %p1319_p8, %p1313_p5 }
  0x17   :  { %1323 = shalt.err (!%p1320_p9)
}
  0x18   :  { %s1354_s25 = smov 128   ;;  %s1355_s26 = smov 8  }
  0x19   :  { %39 = dma.hbm_to_vmem [thread:$0]  %s1632_s3, 4096, %s34_s23, [#allocation6], %s1354_s25, %s1354_s25, %s1355_s26  }
  0x1a   :  { %1344 = dma.done.wait [#allocation3], 2048  }
  0x1b   :  { %1345 = vsyncadd [#allocation3], 4294965248 }
  0x1c   :  { %1346 = dma.done.wait [#allocation6], 4096  }
  0x1d   :  { %1347 = vsyncadd [#allocation6], 4294963200  ;;  %v1356_v0 = vmov 0   ;;  %v1220_v1 = vld [vmem:[#allocation2 + $0x78] sm:$0xff]   ;;  %v1222_v3 = vld [vmem:[#allocation2 + $0x70] sm:$0xff]  }
  0x1e   :  { %1219 = vset.pattern.permute.xlu1 %v1356_v0  ;;  %1218 = vset.pattern.permute.xlu0 %v1356_v0  ;;  %v1221_v2 = vld [vmem:[#allocation2 + $0x38] sm:$0xff]   ;;  %v1223_v4 = vld [vmem:[#allocation2 + $0x30] sm:$0xff]   ;;  %v1224_v5 = vld [vmem:[#allocation2 + $0x68] sm:$0xff]  }
  0x1f   :  { %1081 = vmatprep.subr.bf16.mxu0 %v1220_v1  ;;  %1193 = vmatprep.subr.bf16.mxu1 %v1220_v1  ;;  %v1225_v6 = vld [vmem:[#allocation2 + $0x28] sm:$0xff]   ;;  %v1226_v7 = vld [vmem:[#allocation2 + $0x60] sm:$0xff]   ;;  %v1228_v9 = vld [vmem:[#allocation2 + $0x58] sm:$0xff]  }
  0x20   :  { %1082 = vmatpush3.bf16.msra.mxu0 %v1221_v2  ;;  %1201 = vmatpush3.bf16.msra.mxu1 %v1221_v2  ;;  %v1227_v8 = vld [vmem:[#allocation2 + $0x20] sm:$0xff]   ;;  %v1229_v10 = vld [vmem:[#allocation2 + $0x18] sm:$0xff]   ;;  %v1230_v11 = vld [vmem:[#allocation2 + $0x50] sm:$0xff]  }
  0x21   :  { %1083 = vmatprep.subr.bf16.mxu0 %v1222_v3  ;;  %1194 = vmatprep.subr.bf16.mxu1 %v1222_v3  ;;  %v1238_v12 = vld [vmem:[%s1629_s0 + $0x4] ss:$8 sps:$4 sm:$0xff]   ;;  %v1231_v14 = vld [vmem:[#allocation2 + $0x10] sm:$0xff]   ;;  %v698_v21 = vld [vmem:[%s1631_s2 + $0x18] sm:$0xff] }
  0x22   :  { %v1241_v13 = vld [vmem:[%s1629_s0 + $0x84] ss:$8 sps:$4 sm:$0xff]   ;;  %467 = vmatprep.mubr.bf16.mxu0 %v1238_v12  ;;  %v697_v18 = vld [vmem:[%s1631_s2 + $0x10] sm:$0xff]  ;;  %v1236_v23 = vld [vmem:[%s1629_s0] ss:$8 sps:$4 sm:$0xff]  }
  0x23   :  { %v1232_v15 = vld [vmem:[#allocation2 + $0x48] sm:$0xff]   ;;  %531 = vmatprep.mubr.bf16.mxu1 %v1241_v13  ;;  %v1234_v17 = vld [vmem:[#allocation2 + $0x40] sm:$0xff]   ;;  %739 = vperm.xlu1 %1219, %v697_v18   ;;  %v1242_v27 = vld [vmem:[%s1629_s0 + $0x14] ss:$8 sps:$4 sm:$0xff]  }
  0x24   :  { %1084 = vmatpush3.bf16.msra.mxu0 %v1223_v4  ;;  %1202 = vmatpush3.bf16.msra.mxu1 %v1223_v4  ;;  %v1233_v16 = vld [vmem:[#allocation2 + $0x8] sm:$0xff]   ;;  %v695_v19 = vld [vmem:[%s1631_s2] sm:$0xff]  ;;  %v1244_v28 = vld [vmem:[%s1629_s0 + $0x94] ss:$8 sps:$4 sm:$0xff]  }
  0x25   :  { %1085 = vmatprep.subr.bf16.mxu0 %v1224_v5  ;;  %1195 = vmatprep.subr.bf16.mxu1 %v1224_v5  ;;  %v1235_v20 = vld [vmem:[#allocation2] sm:$0xff]   ;;  %v696_v22 = vld [vmem:[%s1631_s2 + $0x8] sm:$0xff]  ;;  %v702_v29 = vld [vmem:[%s1631_s2 + $0x38] sm:$0xff] }
  0x26   :  { %729 = vperm.xlu0 %1218, %v695_v19   ;;  %v1239_v24 = vld [vmem:[%s1629_s0 + $0x80] ss:$8 sps:$4 sm:$0xff]   ;;  %v701_v30 = vld [vmem:[%s1631_s2 + $0x30] sm:$0xff]  ;;  %v1248_v35 = vld [vmem:[%s1629_s0 + $0x24] ss:$8 sps:$4 sm:$0xff]  }
  0x27   :  { %744 = vperm.xlu1 %1219, %v698_v21   ;;  %v700_v25 = vld [vmem:[%s1631_s2 + $0x28] sm:$0xff]  ;;  %v699_v26 = vld [vmem:[%s1631_s2 + $0x20] sm:$0xff]  ;;  %v1246_v31 = vld [vmem:[%s1629_s0 + $0x10] ss:$8 sps:$4 sm:$0xff]  }
  0x28   :  { %1086 = vmatpush3.bf16.msra.mxu0 %v1225_v6  ;;  %1203 = vmatpush3.bf16.msra.mxu1 %v1225_v6  ;;  %v1247_v32 = vld [vmem:[%s1629_s0 + $0x90] ss:$8 sps:$4 sm:$0xff]   ;;  %v704_v33 = vld [vmem:[%s1631_s2 + $0x48] sm:$0xff]  ;;  %v703_v34 = vld [vmem:[%s1631_s2 + $0x40] sm:$0xff] }
  0x29   :  { %1087 = vmatprep.subr.bf16.mxu0 %v1226_v7  ;;  %1196 = vmatprep.subr.bf16.mxu1 %v1226_v7  ;;  %v1250_v36 = vld [vmem:[%s1629_s0 + $0xa4] ss:$8 sps:$4 sm:$0xff]   ;;  %v706_v37 = vld [vmem:[%s1631_s2 + $0x58] sm:$0xff]  ;;  %v705_v38 = vld [vmem:[%s1631_s2 + $0x50] sm:$0xff] }
  0x2a   :  { %734 = vperm.xlu0 %1218, %v696_v22   ;;  %v1252_v39 = vld [vmem:[%s1629_s0 + $0x20] ss:$8 sps:$4 sm:$0xff]   ;;  %v1254_v43 = vld [vmem:[%s1629_s0 + $0x34] ss:$8 sps:$4 sm:$0xff]   ;;  %v1258_v47 = vld [vmem:[%s1629_s0 + $0x30] ss:$8 sps:$4 sm:$0xff]  }
  0x2b   :  { %754 = vperm.xlu1 %1219, %v700_v25   ;;  %v1253_v40 = vld [vmem:[%s1629_s0 + $0xa0] ss:$8 sps:$4 sm:$0xff]   ;;  %v1256_v44 = vld [vmem:[%s1629_s0 + $0xb4] ss:$8 sps:$4 sm:$0xff]   ;;  %v1259_v48 = vld [vmem:[%s1629_s0 + $0xb0] ss:$8 sps:$4 sm:$0xff]  }
  0x2c   :  { %1088 = vmatpush3.bf16.msra.mxu0 %v1227_v8  ;;  %1204 = vmatpush3.bf16.msra.mxu1 %v1227_v8  ;;  %v708_v41 = vld [vmem:[%s1631_s2 + $0x68] sm:$0xff]  ;;  %v707_v42 = vld [vmem:[%s1631_s2 + $0x60] sm:$0xff]  ;;  %v710_v45 = vld [vmem:[%s1631_s2 + $0x78] sm:$0xff] }
  0x2d   :  { %1089 = vmatprep.subr.bf16.mxu0 %v1228_v9  ;;  %1197 = vmatprep.subr.bf16.mxu1 %v1228_v9  ;;  %v709_v46 = vld [vmem:[%s1631_s2 + $0x70] sm:$0xff]  ;;  %v712_v49 = vld [vmem:[%s1631_s2 + $0x88] sm:$0xff]  ;;  %v711_v50 = vld [vmem:[%s1631_s2 + $0x80] sm:$0xff] }
  0x2e   :  { %749 = vperm.xlu0 %1218, %v699_v26   ;;  %v1260_v51 = vld [vmem:[%s1629_s0 + $0x44] ss:$8 sps:$4 sm:$0xff]   ;;  %v714_v53 = vld [vmem:[%s1631_s2 + $0x98] sm:$0xff]  ;;  %v713_v54 = vld [vmem:[%s1631_s2 + $0x90] sm:$0xff] }
  0x2f   :  { %764 = vperm.xlu1 %1219, %v702_v29   ;;  %v1262_v52 = vld [vmem:[%s1629_s0 + $0xc4] ss:$8 sps:$4 sm:$0xff]   ;;  %v1264_v55 = vld [vmem:[%s1629_s0 + $0x40] ss:$8 sps:$4 sm:$0xff]   ;;  %v1266_v59 = vld [vmem:[%s1629_s0 + $0x54] ss:$8 sps:$4 sm:$0xff]  }
  0x30   :  { %1090 = vmatpush3.bf16.msra.mxu0 %v1229_v10  ;;  %1205 = vmatpush3.bf16.msra.mxu1 %v1229_v10  ;;  %v1265_v56 = vld [vmem:[%s1629_s0 + $0xc0] ss:$8 sps:$4 sm:$0xff]   ;;  %v1268_v60 = vld [vmem:[%s1629_s0 + $0xd4] ss:$8 sps:$4 sm:$0xff]   ;;  %v1270_v63 = vld [vmem:[%s1629_s0 + $0x50] ss:$8 sps:$4 sm:$0xff]  }
  0x31   :  { %1091 = vmatprep.subr.bf16.mxu0 %v1230_v11  ;;  %1198 = vmatprep.subr.bf16.mxu1 %v1230_v11  ;;  %v716_v57 = vld [vmem:[%s1631_s2 + $0xa8] sm:$0xff]  ;;  %v715_v58 = vld [vmem:[%s1631_s2 + $0xa0] sm:$0xff]  ;;  %v718_v61 = vld [vmem:[%s1631_s2 + $0xb8] sm:$0xff] }
  0x32   :  { %759 = vperm.xlu0 %1218, %v701_v30   ;;  %v717_v62 = vld [vmem:[%s1631_s2 + $0xb0] sm:$0xff]  ;;  %v720_v1 = vld [vmem:[%s1631_s2 + $0xc8] sm:$0xff]  ;;  %v719_v2 = vld [vmem:[%s1631_s2 + $0xc0] sm:$0xff] }
  0x33   :  { %774 = vperm.xlu1 %1219, %v704_v33   ;;  %v1271_v0 = vld [vmem:[%s1629_s0 + $0xd0] ss:$8 sps:$4 sm:$0xff]   ;;  %v1272_v3 = vld [vmem:[%s1629_s0 + $0x64] ss:$8 sps:$4 sm:$0xff]   ;;  %v1276_v7 = vld [vmem:[%s1629_s0 + $0x60] ss:$8 sps:$4 sm:$0xff]  }
  0x34   :  { %1092 = vmatpush3.bf16.msra.mxu0 %v1231_v14  ;;  %1206 = vmatpush3.bf16.msra.mxu1 %v1231_v14  ;;  %v1274_v4 = vld [vmem:[%s1629_s0 + $0xe4] ss:$8 sps:$4 sm:$0xff]   ;;  %v722_v5 = vld [vmem:[%s1631_s2 + $0xd8] sm:$0xff]  ;;  %v721_v6 = vld [vmem:[%s1631_s2 + $0xd0] sm:$0xff] }
  0x35   :  { %1093 = vmatprep.subr.bf16.mxu0 %v1232_v15  ;;  %1199 = vmatprep.subr.bf16.mxu1 %v1232_v15  ;;  %v1277_v8 = vld [vmem:[%s1629_s0 + $0xe0] ss:$8 sps:$4 sm:$0xff]   ;;  %v1278_v11 = vld [vmem:[%s1629_s0 + $0x74] ss:$8 sps:$4 sm:$0xff]   ;;  %v1282_v15 = vld [vmem:[%s1629_s0 + $0x70] ss:$8 sps:$4 sm:$0xff]  }
  0x36   :  { %769 = vperm.xlu0 %1218, %v703_v34   ;;  %v724_v9 = vld [vmem:[%s1631_s2 + $0xe8] sm:$0xff]  ;;  %v723_v10 = vld [vmem:[%s1631_s2 + $0xe0] sm:$0xff]  ;;  %v1280_v12 = vld [vmem:[%s1629_s0 + $0xf4] ss:$8 sps:$4 sm:$0xff]  }
  0x37   :  { %784 = vperm.xlu1 %1219, %v706_v37   ;;  %v726_v13 = vld [vmem:[%s1631_s2 + $0xf8] sm:$0xff]  ;;  %v725_v14 = vld [vmem:[%s1631_s2 + $0xf0] sm:$0xff] }
  0x38   :  { %1094 = vmatpush3.bf16.msra.mxu0 %v1233_v16  ;;  %1207 = vmatpush3.bf16.msra.mxu1 %v1233_v16  ;;  %v1283_v16 = vld [vmem:[%s1629_s0 + $0xf0] ss:$8 sps:$4 sm:$0xff]   ;;  %s1357_s0 = smov [#allocation7]  }
  0x39   :  { %1095 = vmatprep.subr.bf16.mxu0 %v1234_v17  ;;  %1200 = vmatprep.subr.bf16.mxu1 %v1234_v17  ;;  %s1020_s2 = sshll.u32 %s1357_s0, 4  ;;  %s1021_s2 = int_to_ptr.vmem [resolvable:$true] %s1020_s2 }
  0x3a   :  { %779 = vperm.xlu0 %1218, %v705_v38   ;;  %s1324_s27 = scalar_lea.vmem %s1021_s2, 4096  ;;  %p1329_p11 = scmp.lt.s32.totalorder %s1021_s2, %s1021_s2 }
  0x3b   :  { %794 = vperm.xlu1 %1219, %v708_v41   ;;  %p1325_p10 = scmp.ne.s32.totalorder %s1021_s2, %s1324_s27  ;;  %p1330_p12 = scmp.lt.s32.totalorder %s1324_s27, %s1324_s27 }
  0x3c   :  { %1096 = vmatpush3.bf16.msra.mxu0 %v1235_v20  ;;  %1208 = vmatpush3.bf16.msra.mxu1 %v1235_v20 }
  0x3d   :  { %p1331_p13 = por %p1330_p12, %p1329_p11 }
  0x3e   :  { %789 = vperm.xlu0 %1218, %v707_v42   ;;  %v919_v42 = vld [vmem:[#allocation5] sm:$0xff] }
  0x3f   :  { %468 = vmatmul.mubr.bf16.vlgmr.msra.gmra.mxu0 %v1236_v23  ;;  %532 = vmatmul.mubr.bf16.vlgmr.msra.gmra.mxu1 %v1239_v24  ;;  %p1332_p0 = pnand %p1331_p13, %p1325_p10 }
  0x40   :  { %475 = vmatprep.mubr.bf16.mxu0 %v1242_v27  ;;  %539 = vmatprep.mubr.bf16.mxu1 %v1244_v28 }
  0x41   :  { %804 = vperm.xlu1 %1219, %v710_v45  }
  0x42   :  { %799 = vperm.xlu0 %1218, %v709_v46  }
  0x45   :  { %814 = vperm.xlu1 %1219, %v712_v49  }
  0x46   :  { %809 = vperm.xlu0 %1218, %v711_v50  }
  0x47   :  { %476 = vmatmul.mubr.bf16.gmra.mxu0 %v1246_v31  ;;  %540 = vmatmul.mubr.bf16.gmra.mxu1 %v1247_v32 }
  0x48   :  { %483 = vmatprep.mubr.bf16.mxu0 %v1248_v35  ;;  %547 = vmatprep.mubr.bf16.mxu1 %v1250_v36 }
  0x49   :  { %824 = vperm.xlu1 %1219, %v714_v53  }
  0x4a   :  { %819 = vperm.xlu0 %1218, %v713_v54  }
  0x4d   :  { %834 = vperm.xlu1 %1219, %v716_v57  }
  0x4e   :  { %829 = vperm.xlu0 %1218, %v715_v58  }
  0x4f   :  { %484 = vmatmul.mubr.bf16.gmra.mxu0 %v1252_v39  ;;  %548 = vmatmul.mubr.bf16.gmra.mxu1 %v1253_v40 }
  0x50   :  { %491 = vmatprep.mubr.bf16.mxu0 %v1254_v43  ;;  %555 = vmatprep.mubr.bf16.mxu1 %v1256_v44  ;;  %v935_v43 = vld [vmem:[#allocation5 + $0x80] sm:$0xff] }
  0x51   :  { %844 = vperm.xlu1 %1219, %v718_v61  }
  0x52   :  { %839 = vperm.xlu0 %1218, %v717_v62  }
  0x55   :  { %854 = vperm.xlu1 %1219, %v720_v1  }
  0x56   :  { %849 = vperm.xlu0 %1218, %v719_v2  }
  0x57   :  { %492 = vmatmul.mubr.bf16.gmra.mxu0 %v1258_v47  ;;  %556 = vmatmul.mubr.bf16.gmra.mxu1 %v1259_v48 }
  0x58   :  { %499 = vmatprep.mubr.bf16.mxu0 %v1260_v51  ;;  %563 = vmatprep.mubr.bf16.mxu1 %v1262_v52 }
  0x59   :  { %864 = vperm.xlu1 %1219, %v722_v5   ;;  %v937_v5 = vld [vmem:[#allocation5 + $0x90] sm:$0xff] }
  0x5a   :  { %859 = vperm.xlu0 %1218, %v721_v6  }
  0x5d   :  { %874 = vperm.xlu1 %1219, %v724_v9  }
  0x5e   :  { %869 = vperm.xlu0 %1218, %v723_v10  }
  0x5f   :  { %500 = vmatmul.mubr.bf16.gmra.mxu0 %v1264_v55  ;;  %564 = vmatmul.mubr.bf16.gmra.mxu1 %v1265_v56  ;;  %v920_v55 = vld [vmem:[#allocation5 + $0x8] sm:$0xff] }
  0x60   :  { %507 = vmatprep.mubr.bf16.mxu0 %v1266_v59  ;;  %571 = vmatprep.mubr.bf16.mxu1 %v1268_v60  ;;  %v936_v56 = vld [vmem:[#allocation5 + $0x88] sm:$0xff] }
  0x61   :  { %884 = vperm.xlu1 %1219, %v726_v13  }
  0x62   :  { %879 = vperm.xlu0 %1218, %v725_v14  }
  0x67   :  { %508 = vmatmul.mubr.bf16.gmra.mxu0 %v1270_v63  ;;  %572 = vmatmul.mubr.bf16.gmra.mxu1 %v1271_v0 }
  0x68   :  { %515 = vmatprep.mubr.bf16.mxu0 %v1272_v3  ;;  %579 = vmatprep.mubr.bf16.mxu1 %v1274_v4  ;;  %v921_v4 = vld [vmem:[#allocation5 + $0x10] sm:$0xff] }
  0x6f   :  { %516 = vmatmul.mubr.bf16.gmra.mxu0 %v1276_v7  ;;  %580 = vmatmul.mubr.bf16.gmra.mxu1 %v1277_v8 }
  0x70   :  { %523 = vmatprep.mubr.bf16.mxu0 %v1278_v11  ;;  %587 = vmatprep.mubr.bf16.mxu1 %v1280_v12 }
  0x77   :  { %524 = vmatmul.mubr.bf16.gmra.mxu0 %v1282_v15  ;;  %588 = vmatmul.mubr.bf16.gmra.mxu1 %v1283_v16 }
  0x9e   :  { %v740_v18 = vpop.permute.xlu1 %739 }
  0xa1   :  { %v730_v17 = vpop.permute.xlu0 %729 }
  0xa2   :  { %v1584_v20 = vpop.permute.xlu1 %744 }
  0xa5   :  { %v735_v19 = vpop.permute.xlu0 %734 }
  0xa6   :  { %v1588_v22 = vpop.permute.xlu1 %754 }
  0xa9   :  { %v1586_v21 = vpop.permute.xlu0 %749 }
  0xaa   :  { %v1592_v24 = vpop.permute.xlu1 %764 }
  0xad   :  { %v1590_v23 = vpop.permute.xlu0 %759 }
  0xae   :  { %v1596_v26 = vpop.permute.xlu1 %774 }
  0xb1   :  { %v1594_v25 = vpop.permute.xlu0 %769 }
  0xb2   :  { %v1600_v28 = vpop.permute.xlu1 %784 }
  0xb5   :  { %v1598_v27 = vpop.permute.xlu0 %779 }
  0xb6   :  { %v1604_v30 = vpop.permute.xlu1 %794 }
  0xb9   :  { %v1602_v29 = vpop.permute.xlu0 %789 }
  0xbc   :  { %v1608_v36 = vpop.permute.xlu1 %804 }
  0xbd   :  { %v1606_v31 = vpop.permute.xlu0 %799 }
  0xc0   :  { %v815_v52 = vpop.permute.xlu1 %814 }
  0xc1   :  { %v810_v41 = vpop.permute.xlu0 %809 }
  0xc4   :  { %v825_v14 = vpop.permute.xlu1 %824 }
  0xc5   :  { %v820_v1 = vpop.permute.xlu0 %819 }
  0xff   :  { %v1097_v32 = vpop.f32.mrf.mxu0  ;;  %v1145_v33 = vpop.f32.mrf.mxu1 }
 0x101   :  { %v1098_v34 = vpop.f32.mrf.mxu0  ;;  %v1146_v35 = vpop.f32.mrf.mxu1 }
 0x102   :  { %v1099_v37 = vadd.f32 %v1098_v34, %v1097_v32  ;;  %v1147_v38 = vadd.f32 %v1146_v35, %v1145_v33 }
 0x103   :  { %v1100_v39 = vpop.f32.mrf.mxu0  ;;  %v1148_v40 = vpop.f32.mrf.mxu1 }
 0x104   :  { %v887_v46 = vmul.f32 %v1099_v37, %v730_v17  ;;  %v903_v47 = vmul.f32 %v1147_v38, %v810_v41  ;;  %v922_v17 = vld [vmem:[#allocation5 + $0x18] sm:$0xff] }
 0x105   :  { %v1101_v44 = vpop.f32.mrf.mxu0  ;;  %v1149_v45 = vpop.f32.mrf.mxu1 }
 0x106   :  { %v1102_v48 = vadd.f32 %v1101_v44, %v1100_v39  ;;  %v1150_v49 = vadd.f32 %v1149_v45, %v1148_v40  ;;  %v951_v53 = vadd.f32 %v919_v42, %v887_v46  ;;  %v967_v54 = vadd.f32 %v935_v43, %v903_v47  ;;  %v830_v40 = vpop.permute.xlu0 %829  ;;  %v923_v43 = vld [vmem:[#allocation5 + $0x20] sm:$0xff] }
 0x107   :  { %v1103_v50 = vpop.f32.mrf.mxu0  ;;  %v1151_v51 = vpop.f32.mrf.mxu1  ;;  %v939_v44 = vld [vmem:[#allocation5 + $0xa0] sm:$0xff] }
 0x108   :  { %983 = vst [vmem:[#allocation7] sm:$0xff] %v951_v53  ;;  %999 = vst [vmem:[#allocation7 + $0x80] sm:$0xff] %v967_v54  ;;  %v888_v59 = vmul.f32 %v1102_v48, %v735_v19  ;;  %v904_v60 = vmul.f32 %v1150_v49, %v815_v52  ;;  %v938_v19 = vld [vmem:[#allocation5 + $0x98] sm:$0xff]  ;;  %v835_v52 = vpop.permute.xlu1 %834 }
 0x109   :  { %v1104_v57 = vpop.f32.mrf.mxu0  ;;  %v1152_v58 = vpop.f32.mrf.mxu1 }
 0x10a   :  { %v1105_v61 = vadd.f32 %v1104_v57, %v1103_v50  ;;  %v1153_v62 = vadd.f32 %v1152_v58, %v1151_v51  ;;  %v952_v2 = vadd.f32 %v920_v55, %v888_v59  ;;  %v968_v3 = vadd.f32 %v936_v56, %v904_v60  ;;  %v924_v55 = vld [vmem:[#allocation5 + $0x28] sm:$0xff] }
 0x10b   :  { %v1106_v63 = vpop.f32.mrf.mxu0  ;;  %v1154_v0 = vpop.f32.mrf.mxu1  ;;  %v940_v56 = vld [vmem:[#allocation5 + $0xa8] sm:$0xff] }
 0x10c   :  { %984 = vst [vmem:[#allocation7 + $0x8] sm:$0xff] %v952_v2  ;;  %1000 = vst [vmem:[#allocation7 + $0x88] sm:$0xff] %v968_v3  ;;  %v889_v8 = vmul.f32 %v1105_v61, %v740_v18  ;;  %v905_v9 = vmul.f32 %v1153_v62, %v820_v1  ;;  %v925_v3 = vld [vmem:[#allocation5 + $0x30] sm:$0xff] }
 0x10d   :  { %v1107_v6 = vpop.f32.mrf.mxu0  ;;  %v1155_v7 = vpop.f32.mrf.mxu1 }
 0x10e   :  { %v1108_v10 = vadd.f32 %v1107_v6, %v1106_v63  ;;  %v1156_v11 = vadd.f32 %v1155_v7, %v1154_v0  ;;  %v953_v15 = vadd.f32 %v921_v4, %v889_v8  ;;  %v969_v16 = vadd.f32 %v937_v5, %v905_v9  ;;  %v840_v0 = vpop.permute.xlu0 %839  ;;  %v941_v4 = vld [vmem:[#allocation5 + $0xb0] sm:$0xff] }
 0x10f   :  { %v1109_v12 = vpop.f32.mrf.mxu0  ;;  %v1157_v13 = vpop.f32.mrf.mxu1 }
 0x110   :  { %985 = vst [vmem:[#allocation7 + $0x10] sm:$0xff] %v953_v15  ;;  %1001 = vst [vmem:[#allocation7 + $0x90] sm:$0xff] %v969_v16  ;;  %v890_v34 = vmul.f32 %v1108_v10, %v1584_v20  ;;  %v906_v35 = vmul.f32 %v1156_v11, %v825_v14  ;;  %v926_v15 = vld [vmem:[#allocation5 + $0x38] sm:$0xff] }
 0x111   :  { %v1110_v32 = vpop.f32.mrf.mxu0  ;;  %v1158_v33 = vpop.f32.mrf.mxu1  ;;  %v942_v16 = vld [vmem:[#allocation5 + $0xb8] sm:$0xff] }
 0x112   :  { %v1111_v37 = vadd.f32 %v1110_v32, %v1109_v12  ;;  %v1159_v38 = vadd.f32 %v1158_v33, %v1157_v13  ;;  %v954_v41 = vadd.f32 %v922_v17, %v890_v34  ;;  %v970_v42 = vadd.f32 %v938_v19, %v906_v35  ;;  %v845_v12 = vpop.permute.xlu1 %844 }
 0x113   :  { %v1112_v18 = vpop.f32.mrf.mxu0  ;;  %v1160_v39 = vpop.f32.mrf.mxu1 }
 0x114   :  { %986 = vst [vmem:[#allocation7 + $0x18] sm:$0xff] %v954_v41  ;;  %1002 = vst [vmem:[#allocation7 + $0x98] sm:$0xff] %v970_v42  ;;  %v891_v47 = vmul.f32 %v1111_v37, %v1586_v21  ;;  %v907_v48 = vmul.f32 %v1159_v38, %v830_v40  ;;  %v850_v38 = vpop.permute.xlu0 %849  ;;  %v927_v40 = vld [vmem:[#allocation5 + $0x40] sm:$0xff] }
 0x115   :  { %v1113_v45 = vpop.f32.mrf.mxu0  ;;  %v1161_v46 = vpop.f32.mrf.mxu1  ;;  %v943_v41 = vld [vmem:[#allocation5 + $0xc0] sm:$0xff] }
 0x116   :  { %v1114_v49 = vadd.f32 %v1113_v45, %v1112_v18  ;;  %v1162_v50 = vadd.f32 %v1161_v46, %v1160_v39  ;;  %v955_v53 = vadd.f32 %v923_v43, %v891_v47  ;;  %v971_v54 = vadd.f32 %v939_v44, %v907_v48 }
 0x117   :  { %v1115_v20 = vpop.f32.mrf.mxu0  ;;  %v1163_v51 = vpop.f32.mrf.mxu1 }
 0x118   :  { %987 = vst [vmem:[#allocation7 + $0x20] sm:$0xff] %v955_v53  ;;  %1003 = vst [vmem:[#allocation7 + $0xa0] sm:$0xff] %v971_v54  ;;  %v892_v59 = vmul.f32 %v1114_v49, %v1588_v22  ;;  %v908_v60 = vmul.f32 %v1162_v50, %v835_v52  ;;  %v855_v49 = vpop.permute.xlu1 %854  ;;  %v944_v52 = vld [vmem:[#allocation5 + $0xc8] sm:$0xff] }
 0x119   :  { %v1116_v57 = vpop.f32.mrf.mxu0  ;;  %v1164_v58 = vpop.f32.mrf.mxu1 }
 0x11a   :  { %v1117_v61 = vadd.f32 %v1116_v57, %v1115_v20  ;;  %v1165_v62 = vadd.f32 %v1164_v58, %v1163_v51  ;;  %v956_v1 = vadd.f32 %v924_v55, %v892_v59  ;;  %v972_v2 = vadd.f32 %v940_v56, %v908_v60  ;;  %v928_v51 = vld [vmem:[#allocation5 + $0x48] sm:$0xff]  ;;  %v860_v60 = vpop.permute.xlu0 %859 }
 0x11b   :  { %v1118_v21 = vpop.f32.mrf.mxu0  ;;  %v1166_v63 = vpop.f32.mrf.mxu1 }
 0x11c   :  { %988 = vst [vmem:[#allocation7 + $0x28] sm:$0xff] %v956_v1  ;;  %1004 = vst [vmem:[#allocation7 + $0xa8] sm:$0xff] %v972_v2  ;;  %v893_v7 = vmul.f32 %v1117_v61, %v1590_v23  ;;  %v909_v8 = vmul.f32 %v1165_v62, %v840_v0 }
 0x11d   :  { %v1119_v5 = vpop.f32.mrf.mxu0  ;;  %v1167_v6 = vpop.f32.mrf.mxu1 }
 0x11e   :  { %v1120_v9 = vadd.f32 %v1119_v5, %v1118_v21  ;;  %v1168_v10 = vadd.f32 %v1167_v6, %v1166_v63  ;;  %v957_v13 = vadd.f32 %v925_v3, %v893_v7  ;;  %v973_v14 = vadd.f32 %v941_v4, %v909_v8  ;;  %v929_v21 = vld [vmem:[#allocation5 + $0x50] sm:$0xff]  ;;  %v865_v7 = vpop.permute.xlu1 %864 }
 0x11f   :  { %v1121_v22 = vpop.f32.mrf.mxu0  ;;  %v1169_v11 = vpop.f32.mrf.mxu1  ;;  %v945_v63 = vld [vmem:[#allocation5 + $0xd0] sm:$0xff] }
 0x120   :  { %989 = vst [vmem:[#allocation7 + $0x30] sm:$0xff] %v957_v13  ;;  %1005 = vst [vmem:[#allocation7 + $0xb0] sm:$0xff] %v973_v14  ;;  %v894_v32 = vmul.f32 %v1120_v9, %v1592_v24  ;;  %v910_v33 = vmul.f32 %v1168_v10, %v845_v12  ;;  %v930_v10 = vld [vmem:[#allocation5 + $0x58] sm:$0xff] }
 0x121   :  { %v1122_v17 = vpop.f32.mrf.mxu0  ;;  %v1170_v19 = vpop.f32.mrf.mxu1 }
 0x122   :  { %v1123_v34 = vadd.f32 %v1122_v17, %v1121_v22  ;;  %v1171_v35 = vadd.f32 %v1170_v19, %v1169_v11  ;;  %v958_v18 = vadd.f32 %v926_v15, %v894_v32  ;;  %v974_v39 = vadd.f32 %v942_v16, %v910_v33  ;;  %v946_v22 = vld [vmem:[#allocation5 + $0xd8] sm:$0xff]  ;;  %v870_v19 = vpop.permute.xlu0 %869 }
 0x123   :  { %v1124_v23 = vpop.f32.mrf.mxu0  ;;  %v1172_v37 = vpop.f32.mrf.mxu1 }
 0x124   :  { %990 = vst [vmem:[#allocation7 + $0x38] sm:$0xff] %v958_v18  ;;  %1006 = vst [vmem:[#allocation7 + $0xb8] sm:$0xff] %v974_v39  ;;  %v895_v44 = vmul.f32 %v1123_v34, %v1594_v25  ;;  %v911_v45 = vmul.f32 %v1171_v35, %v850_v38  ;;  %v931_v34 = vld [vmem:[#allocation5 + $0x60] sm:$0xff] }
 0x125   :  { %v1125_v42 = vpop.f32.mrf.mxu0  ;;  %v1173_v43 = vpop.f32.mrf.mxu1  ;;  %v947_v35 = vld [vmem:[#allocation5 + $0xe0] sm:$0xff] }
 0x126   :  { %v1126_v46 = vadd.f32 %v1125_v42, %v1124_v23  ;;  %v1174_v47 = vadd.f32 %v1173_v43, %v1172_v37  ;;  %v959_v50 = vadd.f32 %v927_v40, %v895_v44  ;;  %v975_v20 = vadd.f32 %v943_v41, %v911_v45  ;;  %v875_v42 = vpop.permute.xlu1 %874  ;;  %v932_v45 = vld [vmem:[#allocation5 + $0x68] sm:$0xff] }
 0x127   :  { %v1127_v24 = vpop.f32.mrf.mxu0  ;;  %v1175_v48 = vpop.f32.mrf.mxu1 }
 0x128   :  { %991 = vst [vmem:[#allocation7 + $0x40] sm:$0xff] %v959_v50  ;;  %1007 = vst [vmem:[#allocation7 + $0xc0] sm:$0xff] %v975_v20  ;;  %v896_v55 = vmul.f32 %v1126_v46, %v1596_v26  ;;  %v912_v56 = vmul.f32 %v1174_v47, %v855_v49  ;;  %v948_v46 = vld [vmem:[#allocation5 + $0xe8] sm:$0xff] }
 0x129   :  { %v1128_v53 = vpop.f32.mrf.mxu0  ;;  %v1176_v54 = vpop.f32.mrf.mxu1 }
 0x12a   :  { %v1129_v57 = vadd.f32 %v1128_v53, %v1127_v24  ;;  %v1177_v58 = vadd.f32 %v1176_v54, %v1175_v48  ;;  %v960_v61 = vadd.f32 %v928_v51, %v896_v55  ;;  %v976_v62 = vadd.f32 %v944_v52, %v912_v56  ;;  %v880_v52 = vpop.permute.xlu0 %879  ;;  %v933_v55 = vld [vmem:[#allocation5 + $0x70] sm:$0xff] }
 0x12b   :  { %v1130_v25 = vpop.f32.mrf.mxu0  ;;  %v1178_v59 = vpop.f32.mrf.mxu1  ;;  %v949_v56 = vld [vmem:[#allocation5 + $0xf0] sm:$0xff] }
 0x12c   :  { %992 = vst [vmem:[#allocation7 + $0x48] sm:$0xff] %v960_v61  ;;  %1008 = vst [vmem:[#allocation7 + $0xc8] sm:$0xff] %v976_v62  ;;  %v897_v2 = vmul.f32 %v1129_v57, %v1598_v27  ;;  %v913_v3 = vmul.f32 %v1177_v58, %v860_v60 }
 0x12d   :  { %v1131_v0 = vpop.f32.mrf.mxu0  ;;  %v1179_v1 = vpop.f32.mrf.mxu1 }
 0x12e   :  { %v1132_v4 = vadd.f32 %v1131_v0, %v1130_v25  ;;  %v1180_v5 = vadd.f32 %v1179_v1, %v1178_v59  ;;  %v961_v8 = vadd.f32 %v929_v21, %v897_v2  ;;  %v977_v9 = vadd.f32 %v945_v63, %v913_v3  ;;  %v885_v21 = vpop.permute.xlu1 %884  ;;  %v934_v63 = vld [vmem:[#allocation5 + $0x78] sm:$0xff] }
 0x12f   :  { %v1133_v26 = vpop.f32.mrf.mxu0  ;;  %v1181_v6 = vpop.f32.mrf.mxu1  ;;  %v950_v0 = vld [vmem:[#allocation5 + $0xf8] sm:$0xff] }
 0x130   :  { %993 = vst [vmem:[#allocation7 + $0x50] sm:$0xff] %v961_v8  ;;  %1009 = vst [vmem:[#allocation7 + $0xd0] sm:$0xff] %v977_v9  ;;  %v898_v13 = vmul.f32 %v1132_v4, %v1600_v28  ;;  %v914_v14 = vmul.f32 %v1180_v5, %v865_v7 }
 0x131   :  { %v1134_v11 = vpop.f32.mrf.mxu0  ;;  %v1182_v12 = vpop.f32.mrf.mxu1 }
 0x132   :  { %v1135_v15 = vadd.f32 %v1134_v11, %v1133_v26  ;;  %v1183_v16 = vadd.f32 %v1182_v12, %v1181_v6  ;;  %v962_v32 = vadd.f32 %v930_v10, %v898_v13  ;;  %v978_v33 = vadd.f32 %v946_v22, %v914_v14 }
 0x133   :  { %v1136_v27 = vpop.f32.mrf.mxu0  ;;  %v1184_v17 = vpop.f32.mrf.mxu1 }
 0x134   :  { %994 = vst [vmem:[#allocation7 + $0x58] sm:$0xff] %v962_v32  ;;  %1010 = vst [vmem:[#allocation7 + $0xd8] sm:$0xff] %v978_v33  ;;  %v899_v38 = vmul.f32 %v1135_v15, %v1602_v29  ;;  %v915_v18 = vmul.f32 %v1183_v16, %v870_v19 }
 0x135   :  { %v1137_v23 = vpop.f32.mrf.mxu0  ;;  %v1185_v37 = vpop.f32.mrf.mxu1 }
 0x136   :  { %v1138_v39 = vadd.f32 %v1137_v23, %v1136_v27  ;;  %v1186_v40 = vadd.f32 %v1185_v37, %v1184_v17  ;;  %v963_v43 = vadd.f32 %v931_v34, %v899_v38  ;;  %v979_v44 = vadd.f32 %v947_v35, %v915_v18 }
 0x137   :  { %v1139_v28 = vpop.f32.mrf.mxu0  ;;  %v1187_v41 = vpop.f32.mrf.mxu1 }
 0x138   :  { %995 = vst [vmem:[#allocation7 + $0x60] sm:$0xff] %v963_v43  ;;  %1011 = vst [vmem:[#allocation7 + $0xe0] sm:$0xff] %v979_v44  ;;  %v900_v48 = vmul.f32 %v1138_v39, %v1604_v30  ;;  %v916_v49 = vmul.f32 %v1186_v40, %v875_v42 }
 0x139   :  { %v1140_v47 = vpop.f32.mrf.mxu0  ;;  %v1188_v24 = vpop.f32.mrf.mxu1 }
 0x13a   :  { %v1141_v50 = vadd.f32 %v1140_v47, %v1139_v28  ;;  %v1189_v20 = vadd.f32 %v1188_v24, %v1187_v41  ;;  %v964_v53 = vadd.f32 %v932_v45, %v900_v48  ;;  %v980_v54 = vadd.f32 %v948_v46, %v916_v49 }
 0x13b   :  { %v1142_v29 = vpop.f32.mrf.mxu0  ;;  %v1190_v51 = vpop.f32.mrf.mxu1 }
 0x13c   :  { %996 = vst [vmem:[#allocation7 + $0x68] sm:$0xff] %v964_v53  ;;  %1012 = vst [vmem:[#allocation7 + $0xe8] sm:$0xff] %v980_v54  ;;  %v901_v25 = vmul.f32 %v1141_v50, %v1606_v31  ;;  %v917_v59 = vmul.f32 %v1189_v20, %v880_v52 }
 0x13d   :  { %v1143_v57 = vpop.f32.mrf.mxu0  ;;  %v1191_v58 = vpop.f32.mrf.mxu1 }
 0x13e   :  { %v1144_v60 = vadd.f32 %v1143_v57, %v1142_v29  ;;  %v1192_v61 = vadd.f32 %v1191_v58, %v1190_v51  ;;  %v965_v30 = vadd.f32 %v933_v55, %v901_v25  ;;  %v981_v62 = vadd.f32 %v949_v56, %v917_v59 }
 0x140   :  { %997 = vst [vmem:[#allocation7 + $0x70] sm:$0xff] %v965_v30  ;;  %1013 = vst [vmem:[#allocation7 + $0xf0] sm:$0xff] %v981_v62  ;;  %v902_v1 = vmul.f32 %v1144_v60, %v1608_v36  ;;  %v918_v2 = vmul.f32 %v1192_v61, %v885_v21 }
 0x142   :  { %v966_v3 = vadd.f32 %v934_v63, %v902_v1  ;;  %v982_v4 = vadd.f32 %v950_v0, %v918_v2 }
 0x144   :  { %998 = vst [vmem:[#allocation7 + $0x78] sm:$0xff] %v966_v3  ;;  %1014 = vst [vmem:[#allocation7 + $0xf8] sm:$0xff] %v982_v4 }
 0x145   :  { %1335 = shalt.err (!%p1332_p0)
}
 0x146   :  { %1026 = dma.vmem_to_hbm [thread:$0]  %s1021_s2, 4096, %s1633_s4, [#allocation4], %s1354_s25, %s1354_s25, %s1355_s26  }
 0x147   :  { %1348 = dma.done.wait [#allocation4], 4096  }
 0x148   :  { %1349 = vsyncadd [#allocation4], 4294963200 }
 0x149   :  { %1030 = vsyncpa [#allocation3], 1 }
 0x14a   :  { %1031 = vsyncpa [#allocation6], 1 }
 0x14b   :  { %1032 = vsyncpa [#allocation4], 1 }

</bundles_post_ra>
